<compile_context>
chip_gen: v5e
topology: v5e:2x2
jax: 0.10.0
libtpu: 0.0.40
codegen_flags: <defaults>
</compile_context>

<pallas_src>
import functools

import jax
import jax.numpy as jnp
from jax import lax
from jax.experimental import pallas as pl
from jax.experimental.pallas import tpu as pltpu

EMBED_DIMENSION = 64
EMBED_MAX_NORM = 1.0

_DMA_RING = 8   # number of in-flight row-gather DMAs / semaphore ring size


# ---------------------------------------------------------------------------
# Stage 1: gather the B*C embedding rows from HBM, apply max_norm renorm and
# reduce the context axis to the (B, D) mean.  Tiny; runs once per call.
# ---------------------------------------------------------------------------
def _gather_mean_kernel(idx_ref, emb_hbm, mean_ref, gath_ref, sems, *,
                        batch, context):
    n = batch * context

    def start(t):
        # 256-byte row DMA straight from the HBM-resident table.
        pltpu.make_async_copy(
            emb_hbm.at[pl.ds(idx_ref[t], 1)],
            gath_ref.at[pl.ds(t, 1)],
            sems.at[t % _DMA_RING]).start()

    def wait(slot):
        # All row copies are the same (1, D) size, so a same-shape descriptor
        # can be used to wait on the slot's semaphore.
        pltpu.make_async_copy(
            emb_hbm.at[pl.ds(0, 1)],
            gath_ref.at[pl.ds(0, 1)],
            sems.at[slot]).wait()

    # Prime the ring, then keep _DMA_RING row DMAs in flight.
    for t in range(min(_DMA_RING, n)):
        start(t)

    def body(t, carry):
        wait(t % _DMA_RING)

        @pl.when(t + _DMA_RING < n)
        def _():
            start(t + _DMA_RING)

        return carry

    lax.fori_loop(0, n, body, 0)

    rows = gath_ref[...]                                    # (B*C, D)
    # nn.Embedding(max_norm=...): rows with L2 norm > max_norm are rescaled.
    # rsqrt keeps the divide on the EUP; eps differs from torch's
    # (norm + 1e-7) by <1e-7 relative -> well inside the 1e-4 tolerance.
    sumsq = jnp.sum(rows * rows, axis=1, keepdims=True)     # (B*C, 1)
    scale = jnp.minimum(1.0, EMBED_MAX_NORM * lax.rsqrt(sumsq + 1e-14))
    rows = rows * scale

    # Context-major layout: rows for context position c live in the static
    # slice [c*B, (c+1)*B) -> plain VPU adds, no 3-D reshape/reduce.
    acc = rows[0:batch]
    for c in range(1, context):
        acc = acc + rows[c * batch:(c + 1) * batch]
    mean_ref[...] = acc * (1.0 / context)


# ---------------------------------------------------------------------------
# Stage 2: lane-dense V-tiled linear layer: out = mean @ W_t + b.
# W_t is the pre-transposed (D, V_pad) weight -> native NN MXU contraction.
# ---------------------------------------------------------------------------
def _linear_kernel(x_ref, w_ref, b_ref, out_ref):
    out_ref[...] = (
        jnp.dot(x_ref[...], w_ref[...], preferred_element_type=jnp.float32)
        + b_ref[...])


def _pick_vocab_tile(vocab):
    """Largest preferred lane-dense tile with <=12.5% zero-pad waste.

    Capped at 8192 so double-buffered W blocks (+ output blocks) stay well
    inside v5e's 16 MiB default scoped VMEM.
    """
    v128 = ((vocab + 127) // 128) * 128
    for t in (8192, 4096, 2048, 1024, 512, 256, 128):
        padded = ((vocab + t - 1) // t) * t
        if padded - v128 <= v128 // 8:
            return t
    return 128


def prepare_linear_params(lin_w, lin_b):
    """One-time (init-time) layout prep for the nn.Linear parameters.

    lin_w: (V, D) as torch stores it -> returned pre-transposed and
    zero-padded to (D, V_pad) so every weight block is 128-lane dense and the
    matmul is a native (K, N) contraction.  lin_b -> (1, V_pad).
    """
    V, D = lin_w.shape
    tv = _pick_vocab_tile(V)
    v_pad = ((V + tv - 1) // tv) * tv
    w_t = jnp.zeros((D, v_pad), jnp.float32).at[:, :V].set(
        lin_w.T.astype(jnp.float32))
    b = jnp.zeros((1, v_pad), jnp.float32).at[:, :V].set(
        lin_b.astype(jnp.float32)[None, :])
    return w_t, b, tv


def word2vec_cbow_forward(idx, emb_table, lin_w_t, lin_b_row, tv, vocab_size):
    """idx: (B, C) int; emb_table: (V, D) f32;
    lin_w_t: (D, V_pad) f32 (from prepare_linear_params); lin_b_row: (1, V_pad)."""
    B, C = idx.shape
    V, D = emb_table.shape
    d2, v_pad = lin_w_t.shape
    assert d2 == D and v_pad % tv == 0

    # Pad batch to a sublane multiple; tile it to the MXU M dimension when
    # large.  Padded rows gather embedding row 0 and are sliced off.
    b_pad = max(8, ((B + 7) // 8) * 8)
    if b_pad > 256:
        b_pad = ((b_pad + 255) // 256) * 256
        tb = 256
    else:
        tb = b_pad

    idx = idx.astype(jnp.int32)
    if b_pad != B:
        idx = jnp.pad(idx, ((0, b_pad - B), (0, 0)))
    # Context-major 1-D layout: SMEM stays unpadded and the mean reduction in
    # the kernel uses static (B, D) slices.
    idx_flat = idx.T.reshape(-1)                      # (C * b_pad,)

    emb_table = emb_table.astype(jnp.float32)

    # ---- stage 1: gather + renorm + context mean -> (b_pad, D) -------------
    mean = pl.pallas_call(
        functools.partial(_gather_mean_kernel, batch=b_pad, context=C),
        out_shape=jax.ShapeDtypeStruct((b_pad, D), jnp.float32),
        grid_spec=pltpu.PrefetchScalarGridSpec(
            num_scalar_prefetch=1,                         # idx -> SMEM
            grid=(1,),
            in_specs=[pl.BlockSpec(memory_space=pl.ANY)],  # table stays in HBM
            out_specs=pl.BlockSpec((b_pad, D), lambda i, idx_s: (0, 0)),
            scratch_shapes=[
                pltpu.VMEM((b_pad * C, D), jnp.float32),   # gathered rows
                pltpu.SemaphoreType.DMA((_DMA_RING,)),     # DMA sem ring
            ],
        ),
        compiler_params=pltpu.CompilerParams(
            dimension_semantics=("arbitrary",)),
    )(idx_flat, emb_table)

    # ---- stage 2: tiled linear, both axes parallel (megacore-friendly) -----
    grid = (b_pad // tb, v_pad // tv)
    cost = pl.CostEstimate(
        flops=2 * b_pad * D * v_pad,
        transcendentals=0,
        bytes_accessed=(D * v_pad + b_pad * v_pad + b_pad * D + v_pad) * 4)
    out = pl.pallas_call(
        _linear_kernel,
        out_shape=jax.ShapeDtypeStruct((b_pad, v_pad), jnp.float32),
        grid_spec=pltpu.PrefetchScalarGridSpec(
            num_scalar_prefetch=0,
            grid=grid,
            in_specs=[
                pl.BlockSpec((tb, D), lambda bi, j: (bi, 0)),   # context mean
                pl.BlockSpec((D, tv), lambda bi, j: (0, j)),    # W_t, lane dense
                pl.BlockSpec((1, tv), lambda bi, j: (0, j)),    # bias
            ],
            out_specs=pl.BlockSpec((tb, tv), lambda bi, j: (bi, j)),
        ),
        compiler_params=pltpu.CompilerParams(
            dimension_semantics=("parallel", "parallel")),
        cost_estimate=cost,
    )(mean, lin_w_t, lin_b_row)

    return out[:B, :vocab_size]


def reference_forward(idx, emb_table, lin_w, lin_b):
    # torch.renorm semantics: rows with norm > max_norm scaled by
    # max_norm / (norm + 1e-7).
    norm = jnp.linalg.norm(emb_table, axis=1, keepdims=True)
    emb_c = emb_table * jnp.minimum(1.0, EMBED_MAX_NORM / (norm + 1e-7))
    gathered = emb_c[idx]              # (B, C, D)
    x = gathered.mean(axis=1)          # (B, D)
    return x @ lin_w.T + lin_b


if __name__ == "__main__":
    VOCAB_SIZE = 300                   # deliberately not a multiple of 128
    B, C, D = 6, 4, EMBED_DIMENSION    # small demo shapes

    key = jax.random.PRNGKey(0)
    k_idx, k_emb, k_w, k_b = jax.random.split(key, 4)

    # Deterministic parameter init (shapes as the torch module stores them).
    emb_table = jax.random.normal(k_emb, (VOCAB_SIZE, D), dtype=jnp.float32)
    bound = 1.0 / (D ** 0.5)
    lin_w = jax.random.uniform(k_w, (VOCAB_SIZE, D), jnp.float32, -bound, bound)
    lin_b = jax.random.uniform(k_b, (VOCAB_SIZE,), jnp.float32, -bound, bound)

    # One-time layout prep (done at init, not per forward call).
    lin_w_t, lin_b_row, tv = prepare_linear_params(lin_w, lin_b)

    # Example inputs: a batch of context-word index windows.
    idx = jax.random.randint(k_idx, (B, C), 0, VOCAB_SIZE, dtype=jnp.int32)

    out = word2vec_cbow_forward(idx, emb_table, lin_w_t, lin_b_row, tv,
                                VOCAB_SIZE)
    out = jax.block_until_ready(out)

    ref = reference_forward(idx, emb_table, lin_w, lin_b)
    assert out.shape == (B, VOCAB_SIZE)
    assert jnp.allclose(out, ref, atol=1e-4, rtol=1e-4), "mismatch vs reference"

    print("KERNEL_OK")
</pallas_src>

<mosaic_0001>
module attributes {stable_mosaic.version = 11 : i64} {
  func.func @_gather_mean_kernel(%arg0: i32, %arg1: memref<32xi32, #tpu.memory_space<smem>>, %arg2: memref<300x64xf32, #tpu.memory_space<any>>, %arg3: memref<8x64xf32, #tpu.memory_space<vmem>>, %arg4: memref<32x64xf32, #tpu.memory_space<vmem>>, %arg5: memref<8x!tpu.dma_semaphore, #tpu.memory_space<semaphore_mem>>) attributes {dimension_semantics = [#tpu.dimension_semantics<arbitrary>], iteration_bounds = array<i64: 1>, scalar_prefetch = 1 : i64, scratch_operands = 2 : i64, tpu.core_type = #tpu.core_type<tc>, window_params = [{}, {pipeline_mode = #tpu.pipeline_mode<synchronous>, transform_indices = @transform_1, window_bounds = array<i64: 8, 64>}]} {
    %c0 = arith.constant 0 : index
    %0 = memref.load %arg1[%c0] : memref<32xi32, #tpu.memory_space<smem>>
    %c0_i32 = arith.constant 0 : i32
    %c0_i32_0 = arith.constant 0 : i32
    %1 = tpu.memref_slice %arg2[%0, %c0_i32_0] : memref<300x64xf32, #tpu.memory_space<any>> -> memref<1x64xf32, #tpu.memory_space<any>>
    %c0_i32_1 = arith.constant 0 : i32
    %c0_i32_2 = arith.constant 0 : i32
    %2 = tpu.memref_slice %arg4[%c0_i32_1, %c0_i32_2] : memref<32x64xf32, #tpu.memory_space<vmem>> -> memref<1x64xf32, #tpu.memory_space<vmem>>
    %3 = tpu.memref_slice %arg5[%c0_i32] : memref<8x!tpu.dma_semaphore, #tpu.memory_space<semaphore_mem>> -> memref<1x!tpu.dma_semaphore, #tpu.memory_space<semaphore_mem>>
    %4 = tpu.memref_squeeze %3 : memref<1x!tpu.dma_semaphore, #tpu.memory_space<semaphore_mem>> -> memref<!tpu.dma_semaphore, #tpu.memory_space<semaphore_mem>>
    tpu.enqueue_dma source(%1 : memref<1x64xf32, #tpu.memory_space<any>>) target(%2 : memref<1x64xf32, #tpu.memory_space<vmem>>) target_semaphore(%4 : memref<!tpu.dma_semaphore, #tpu.memory_space<semaphore_mem>>)
    %c1 = arith.constant 1 : index
    %5 = memref.load %arg1[%c1] : memref<32xi32, #tpu.memory_space<smem>>
    %c1_i32 = arith.constant 1 : i32
    %c0_i32_3 = arith.constant 0 : i32
    %6 = tpu.memref_slice %arg2[%5, %c0_i32_3] : memref<300x64xf32, #tpu.memory_space<any>> -> memref<1x64xf32, #tpu.memory_space<any>>
    %c1_i32_4 = arith.constant 1 : i32
    %c0_i32_5 = arith.constant 0 : i32
    %7 = tpu.memref_slice %arg4[%c1_i32_4, %c0_i32_5] : memref<32x64xf32, #tpu.memory_space<vmem>> -> memref<1x64xf32, #tpu.memory_space<vmem>>
    %8 = tpu.memref_slice %arg5[%c1_i32] : memref<8x!tpu.dma_semaphore, #tpu.memory_space<semaphore_mem>> -> memref<1x!tpu.dma_semaphore, #tpu.memory_space<semaphore_mem>>
    %9 = tpu.memref_squeeze %8 : memref<1x!tpu.dma_semaphore, #tpu.memory_space<semaphore_mem>> -> memref<!tpu.dma_semaphore, #tpu.memory_space<semaphore_mem>>
    tpu.enqueue_dma source(%6 : memref<1x64xf32, #tpu.memory_space<any>>) target(%7 : memref<1x64xf32, #tpu.memory_space<vmem>>) target_semaphore(%9 : memref<!tpu.dma_semaphore, #tpu.memory_space<semaphore_mem>>)
    %c2 = arith.constant 2 : index
    %10 = memref.load %arg1[%c2] : memref<32xi32, #tpu.memory_space<smem>>
    %c2_i32 = arith.constant 2 : i32
    %c0_i32_6 = arith.constant 0 : i32
    %11 = tpu.memref_slice %arg2[%10, %c0_i32_6] : memref<300x64xf32, #tpu.memory_space<any>> -> memref<1x64xf32, #tpu.memory_space<any>>
    %c2_i32_7 = arith.constant 2 : i32
    %c0_i32_8 = arith.constant 0 : i32
    %12 = tpu.memref_slice %arg4[%c2_i32_7, %c0_i32_8] : memref<32x64xf32, #tpu.memory_space<vmem>> -> memref<1x64xf32, #tpu.memory_space<vmem>>
    %13 = tpu.memref_slice %arg5[%c2_i32] : memref<8x!tpu.dma_semaphore, #tpu.memory_space<semaphore_mem>> -> memref<1x!tpu.dma_semaphore, #tpu.memory_space<semaphore_mem>>
    %14 = tpu.memref_squeeze %13 : memref<1x!tpu.dma_semaphore, #tpu.memory_space<semaphore_mem>> -> memref<!tpu.dma_semaphore, #tpu.memory_space<semaphore_mem>>
    tpu.enqueue_dma source(%11 : memref<1x64xf32, #tpu.memory_space<any>>) target(%12 : memref<1x64xf32, #tpu.memory_space<vmem>>) target_semaphore(%14 : memref<!tpu.dma_semaphore, #tpu.memory_space<semaphore_mem>>)
    %c3 = arith.constant 3 : index
    %15 = memref.load %arg1[%c3] : memref<32xi32, #tpu.memory_space<smem>>
    %c3_i32 = arith.constant 3 : i32
    %c0_i32_9 = arith.constant 0 : i32
    %16 = tpu.memref_slice %arg2[%15, %c0_i32_9] : memref<300x64xf32, #tpu.memory_space<any>> -> memref<1x64xf32, #tpu.memory_space<any>>
    %c3_i32_10 = arith.constant 3 : i32
    %c0_i32_11 = arith.constant 0 : i32
    %17 = tpu.memref_slice %arg4[%c3_i32_10, %c0_i32_11] : memref<32x64xf32, #tpu.memory_space<vmem>> -> memref<1x64xf32, #tpu.memory_space<vmem>>
    %18 = tpu.memref_slice %arg5[%c3_i32] : memref<8x!tpu.dma_semaphore, #tpu.memory_space<semaphore_mem>> -> memref<1x!tpu.dma_semaphore, #tpu.memory_space<semaphore_mem>>
    %19 = tpu.memref_squeeze %18 : memref<1x!tpu.dma_semaphore, #tpu.memory_space<semaphore_mem>> -> memref<!tpu.dma_semaphore, #tpu.memory_space<semaphore_mem>>
    tpu.enqueue_dma source(%16 : memref<1x64xf32, #tpu.memory_space<any>>) target(%17 : memref<1x64xf32, #tpu.memory_space<vmem>>) target_semaphore(%19 : memref<!tpu.dma_semaphore, #tpu.memory_space<semaphore_mem>>)
    %c4 = arith.constant 4 : index
    %20 = memref.load %arg1[%c4] : memref<32xi32, #tpu.memory_space<smem>>
    %c4_i32 = arith.constant 4 : i32
    %c0_i32_12 = arith.constant 0 : i32
    %21 = tpu.memref_slice %arg2[%20, %c0_i32_12] : memref<300x64xf32, #tpu.memory_space<any>> -> memref<1x64xf32, #tpu.memory_space<any>>
    %c4_i32_13 = arith.constant 4 : i32
    %c0_i32_14 = arith.constant 0 : i32
    %22 = tpu.memref_slice %arg4[%c4_i32_13, %c0_i32_14] : memref<32x64xf32, #tpu.memory_space<vmem>> -> memref<1x64xf32, #tpu.memory_space<vmem>>
    %23 = tpu.memref_slice %arg5[%c4_i32] : memref<8x!tpu.dma_semaphore, #tpu.memory_space<semaphore_mem>> -> memref<1x!tpu.dma_semaphore, #tpu.memory_space<semaphore_mem>>
    %24 = tpu.memref_squeeze %23 : memref<1x!tpu.dma_semaphore, #tpu.memory_space<semaphore_mem>> -> memref<!tpu.dma_semaphore, #tpu.memory_space<semaphore_mem>>
    tpu.enqueue_dma source(%21 : memref<1x64xf32, #tpu.memory_space<any>>) target(%22 : memref<1x64xf32, #tpu.memory_space<vmem>>) target_semaphore(%24 : memref<!tpu.dma_semaphore, #tpu.memory_space<semaphore_mem>>)
    %c5 = arith.constant 5 : index
    %25 = memref.load %arg1[%c5] : memref<32xi32, #tpu.memory_space<smem>>
    %c5_i32 = arith.constant 5 : i32
    %c0_i32_15 = arith.constant 0 : i32
    %26 = tpu.memref_slice %arg2[%25, %c0_i32_15] : memref<300x64xf32, #tpu.memory_space<any>> -> memref<1x64xf32, #tpu.memory_space<any>>
    %c5_i32_16 = arith.constant 5 : i32
    %c0_i32_17 = arith.constant 0 : i32
    %27 = tpu.memref_slice %arg4[%c5_i32_16, %c0_i32_17] : memref<32x64xf32, #tpu.memory_space<vmem>> -> memref<1x64xf32, #tpu.memory_space<vmem>>
    %28 = tpu.memref_slice %arg5[%c5_i32] : memref<8x!tpu.dma_semaphore, #tpu.memory_space<semaphore_mem>> -> memref<1x!tpu.dma_semaphore, #tpu.memory_space<semaphore_mem>>
    %29 = tpu.memref_squeeze %28 : memref<1x!tpu.dma_semaphore, #tpu.memory_space<semaphore_mem>> -> memref<!tpu.dma_semaphore, #tpu.memory_space<semaphore_mem>>
    tpu.enqueue_dma source(%26 : memref<1x64xf32, #tpu.memory_space<any>>) target(%27 : memref<1x64xf32, #tpu.memory_space<vmem>>) target_semaphore(%29 : memref<!tpu.dma_semaphore, #tpu.memory_space<semaphore_mem>>)
    %c6 = arith.constant 6 : index
    %30 = memref.load %arg1[%c6] : memref<32xi32, #tpu.memory_space<smem>>
    %c6_i32 = arith.constant 6 : i32
    %c0_i32_18 = arith.constant 0 : i32
    %31 = tpu.memref_slice %arg2[%30, %c0_i32_18] : memref<300x64xf32, #tpu.memory_space<any>> -> memref<1x64xf32, #tpu.memory_space<any>>
    %c6_i32_19 = arith.constant 6 : i32
    %c0_i32_20 = arith.constant 0 : i32
    %32 = tpu.memref_slice %arg4[%c6_i32_19, %c0_i32_20] : memref<32x64xf32, #tpu.memory_space<vmem>> -> memref<1x64xf32, #tpu.memory_space<vmem>>
    %33 = tpu.memref_slice %arg5[%c6_i32] : memref<8x!tpu.dma_semaphore, #tpu.memory_space<semaphore_mem>> -> memref<1x!tpu.dma_semaphore, #tpu.memory_space<semaphore_mem>>
    %34 = tpu.memref_squeeze %33 : memref<1x!tpu.dma_semaphore, #tpu.memory_space<semaphore_mem>> -> memref<!tpu.dma_semaphore, #tpu.memory_space<semaphore_mem>>
    tpu.enqueue_dma source(%31 : memref<1x64xf32, #tpu.memory_space<any>>) target(%32 : memref<1x64xf32, #tpu.memory_space<vmem>>) target_semaphore(%34 : memref<!tpu.dma_semaphore, #tpu.memory_space<semaphore_mem>>)
    %c7 = arith.constant 7 : index
    %35 = memref.load %arg1[%c7] : memref<32xi32, #tpu.memory_space<smem>>
    %c7_i32 = arith.constant 7 : i32
    %c0_i32_21 = arith.constant 0 : i32
    %36 = tpu.memref_slice %arg2[%35, %c0_i32_21] : memref<300x64xf32, #tpu.memory_space<any>> -> memref<1x64xf32, #tpu.memory_space<any>>
    %c7_i32_22 = arith.constant 7 : i32
    %c0_i32_23 = arith.constant 0 : i32
    %37 = tpu.memref_slice %arg4[%c7_i32_22, %c0_i32_23] : memref<32x64xf32, #tpu.memory_space<vmem>> -> memref<1x64xf32, #tpu.memory_space<vmem>>
    %38 = tpu.memref_slice %arg5[%c7_i32] : memref<8x!tpu.dma_semaphore, #tpu.memory_space<semaphore_mem>> -> memref<1x!tpu.dma_semaphore, #tpu.memory_space<semaphore_mem>>
    %39 = tpu.memref_squeeze %38 : memref<1x!tpu.dma_semaphore, #tpu.memory_space<semaphore_mem>> -> memref<!tpu.dma_semaphore, #tpu.memory_space<semaphore_mem>>
    tpu.enqueue_dma source(%36 : memref<1x64xf32, #tpu.memory_space<any>>) target(%37 : memref<1x64xf32, #tpu.memory_space<vmem>>) target_semaphore(%39 : memref<!tpu.dma_semaphore, #tpu.memory_space<semaphore_mem>>)
    %c0_i32_24 = arith.constant 0 : i32
    %c32_i32 = arith.constant 32 : i32
    %40 = arith.addi %c0_i32_24, %c32_i32 : i32
    %c1_i32_25 = arith.constant 1 : i32
    scf.for %arg6 = %c0_i32_24 to %40 step %c1_i32_25  : i32 {
      %c8_i32 = arith.constant 8 : i32
      %c0_i32_35 = arith.constant 0 : i32
      %64 = arith.cmpi eq, %c8_i32, %c0_i32_35 : i32
      %c1_i32_36 = arith.constant 1 : i32
      %65 = arith.select %64, %c1_i32_36, %c8_i32 : i32
      %66 = arith.remsi %arg6, %65 : i32
      %c0_i32_37 = arith.constant 0 : i32
      %67 = arith.cmpi ne, %66, %c0_i32_37 : i32
      %c0_i32_38 = arith.constant 0 : i32
      %68 = arith.cmpi slt, %66, %c0_i32_38 : i32
      %c0_i32_39 = arith.constant 0 : i32
      %69 = arith.cmpi slt, %65, %c0_i32_39 : i32
      %70 = arith.xori %68, %69 : i1
      %71 = arith.andi %70, %67 : i1
      %72 = arith.addi %66, %65 : i32
      %73 = arith.select %71, %72, %66 : i32
      %c0_i32_40 = arith.constant 0 : i32
      %c0_i32_41 = arith.constant 0 : i32
      %74 = tpu.memref_slice %arg2[%c0_i32_40, %c0_i32_41] : memref<300x64xf32, #tpu.memory_space<any>> -> memref<1x64xf32, #tpu.memory_space<any>>
      %c0_i32_42 = arith.constant 0 : i32
      %c0_i32_43 = arith.constant 0 : i32
      %75 = tpu.memref_slice %arg4[%c0_i32_42, %c0_i32_43] : memref<32x64xf32, #tpu.memory_space<vmem>> -> memref<1x64xf32, #tpu.memory_space<vmem>>
      %76 = tpu.memref_slice %arg5[%73] : memref<8x!tpu.dma_semaphore, #tpu.memory_space<semaphore_mem>> -> memref<1x!tpu.dma_semaphore, #tpu.memory_space<semaphore_mem>>
      %77 = tpu.memref_squeeze %76 : memref<1x!tpu.dma_semaphore, #tpu.memory_space<semaphore_mem>> -> memref<!tpu.dma_semaphore, #tpu.memory_space<semaphore_mem>>
      tpu.wait_dma2 semaphore(%77 : memref<!tpu.dma_semaphore, #tpu.memory_space<semaphore_mem>>) src(%74 : memref<1x64xf32, #tpu.memory_space<any>>) dst(%75 : memref<1x64xf32, #tpu.memory_space<vmem>>)
      %c8_i32_44 = arith.constant 8 : i32
      %78 = arith.addi %arg6, %c8_i32_44 : i32
      %c32_i32_45 = arith.constant 32 : i32
      %79 = arith.cmpi slt, %78, %c32_i32_45 : i32
      %80 = arith.extui %79 : i1 to i32
      %c0_i32_46 = arith.constant 0 : i32
      %81 = arith.cmpi ne, %80, %c0_i32_46 : i32
      scf.if %81 {
        %c8_i32_47 = arith.constant 8 : i32
        %82 = arith.addi %arg6, %c8_i32_47 : i32
        %83 = arith.index_cast %82 : i32 to index
        %84 = memref.load %arg1[%83] : memref<32xi32, #tpu.memory_space<smem>>
        %c8_i32_48 = arith.constant 8 : i32
        %c0_i32_49 = arith.constant 0 : i32
        %85 = arith.cmpi eq, %c8_i32_48, %c0_i32_49 : i32
        %c1_i32_50 = arith.constant 1 : i32
        %86 = arith.select %85, %c1_i32_50, %c8_i32_48 : i32
        %87 = arith.remsi %82, %86 : i32
        %c0_i32_51 = arith.constant 0 : i32
        %88 = arith.cmpi ne, %87, %c0_i32_51 : i32
        %c0_i32_52 = arith.constant 0 : i32
        %89 = arith.cmpi slt, %87, %c0_i32_52 : i32
        %c0_i32_53 = arith.constant 0 : i32
        %90 = arith.cmpi slt, %86, %c0_i32_53 : i32
        %91 = arith.xori %89, %90 : i1
        %92 = arith.andi %91, %88 : i1
        %93 = arith.addi %87, %86 : i32
        %94 = arith.select %92, %93, %87 : i32
        %c0_i32_54 = arith.constant 0 : i32
        %95 = tpu.memref_slice %arg2[%84, %c0_i32_54] : memref<300x64xf32, #tpu.memory_space<any>> -> memref<1x64xf32, #tpu.memory_space<any>>
        %c0_i32_55 = arith.constant 0 : i32
        %96 = tpu.memref_slice %arg4[%82, %c0_i32_55] : memref<32x64xf32, #tpu.memory_space<vmem>> -> memref<1x64xf32, #tpu.memory_space<vmem>>
        %97 = tpu.memref_slice %arg5[%94] : memref<8x!tpu.dma_semaphore, #tpu.memory_space<semaphore_mem>> -> memref<1x!tpu.dma_semaphore, #tpu.memory_space<semaphore_mem>>
        %98 = tpu.memref_squeeze %97 : memref<1x!tpu.dma_semaphore, #tpu.memory_space<semaphore_mem>> -> memref<!tpu.dma_semaphore, #tpu.memory_space<semaphore_mem>>
        tpu.enqueue_dma source(%95 : memref<1x64xf32, #tpu.memory_space<any>>) target(%96 : memref<1x64xf32, #tpu.memory_space<vmem>>) target_semaphore(%98 : memref<!tpu.dma_semaphore, #tpu.memory_space<semaphore_mem>>)
      } else {
      }
    }
    %c32_i32_26 = arith.constant 32 : i32
    %c0_27 = arith.constant 0 : index
    %c0_28 = arith.constant 0 : index
    %41 = vector.load %arg4[%c0_27, %c0_28] : memref<32x64xf32, #tpu.memory_space<vmem>>, vector<32x64xf32>
    %42 = arith.mulf %41, %41 : vector<32x64xf32>
    %cst = arith.constant dense<0.000000e+00> : vector<32xf32>
    %43 = vector.multi_reduction <add>, %42, %cst [1] : vector<32x64xf32> to vector<32xf32>
    %44 = vector.shape_cast %43 : vector<32xf32> to vector<32x1xf32>
    %cst_29 = arith.constant 9.99999982E-15 : f32
    %45 = vector.broadcast %cst_29 : f32 to vector<32x1xf32>
    %46 = arith.addf %44, %45 : vector<32x1xf32>
    %47 = math.rsqrt %46 : vector<32x1xf32>
    %cst_30 = arith.constant 1.000000e+00 : f32
    %48 = vector.broadcast %cst_30 : f32 to vector<32x1xf32>
    %49 = arith.mulf %48, %47 : vector<32x1xf32>
    %cst_31 = arith.constant 1.000000e+00 : f32
    %50 = vector.broadcast %cst_31 : f32 to vector<32x1xf32>
    %51 = arith.minimumf %50, %49 : vector<32x1xf32>
    %52 = vector.broadcast %51 : vector<32x1xf32> to vector<32x64xf32>
    %53 = arith.mulf %41, %52 : vector<32x64xf32>
    %54 = vector.extract_strided_slice %53 {offsets = [0, 0], sizes = [8, 64], strides = [1, 1]} : vector<32x64xf32> to vector<8x64xf32>
    %55 = vector.extract_strided_slice %53 {offsets = [8, 0], sizes = [8, 64], strides = [1, 1]} : vector<32x64xf32> to vector<8x64xf32>
    %56 = arith.addf %54, %55 : vector<8x64xf32>
    %57 = vector.extract_strided_slice %53 {offsets = [16, 0], sizes = [8, 64], strides = [1, 1]} : vector<32x64xf32> to vector<8x64xf32>
    %58 = arith.addf %56, %57 : vector<8x64xf32>
    %59 = vector.extract_strided_slice %53 {offsets = [24, 0], sizes = [8, 64], strides = [1, 1]} : vector<32x64xf32> to vector<8x64xf32>
    %60 = arith.addf %58, %59 : vector<8x64xf32>
    %cst_32 = arith.constant 2.500000e-01 : f32
    %61 = vector.broadcast %cst_32 : f32 to vector<8x64xf32>
    %62 = arith.mulf %60, %61 : vector<8x64xf32>
    %c0_33 = arith.constant 0 : index
    %c0_34 = arith.constant 0 : index
    %63 = vector.load %arg3[%c0_33, %c0_34] : memref<8x64xf32, #tpu.memory_space<vmem>>, vector<8x64xf32>
    tpu.vector_store %arg3[%c0_33, %c0_34], %62 {strides = array<i32>} : memref<8x64xf32, #tpu.memory_space<vmem>>, vector<8x64xf32>,
    return
  }
  func.func @transform_1(%arg0: i32, %arg1: memref<32xi32, #tpu.memory_space<smem>>) -> (i32, i32) {
    %c0_i32 = arith.constant 0 : i32
    %c0_i32_0 = arith.constant 0 : i32
    %c0_i32_1 = arith.constant 0 : i32
    return %c0_i32, %c0_i32_0 : i32, i32
  }
}

</mosaic_0001>

<bundles_post_ra>
// kernel: tpu_custom_call.1
= control target key start
LH: loop header
LB: loop body
LE: loop exit
PB: predicated region body
PF: predicated region fallthrough
CT: control target
= control target key end

     0   :  { %s689_s12 = smov [#allocation5]   ;;  %s777_s0 = inlined_call_operand.vmem [shape: s32[32], index: 0, kind: input, shape index: {}]   ;;  %s778_s1 = inlined_call_operand.vmem [shape: f32[300,64], index: 1, kind: input, shape index: {}]   ;;  %s779_s2 = inlined_call_operand.hbm [shape: f32[8,64], index: 2, kind: output, shape index: {}]  }
   0x1   :  { %s8_s11 = sshll.u32 %s777_s0, 4  ;;  %s9_s11 = int_to_ptr.vmem [resolvable:$true] %s8_s11 }
   0x2   :  { %11 = dma.vmem_to_smem %s9_s11, 16, %s689_s12, [#allocation4] }
   0x3   :  { %679 = dma.done.wait [#allocation4], 16 }
   0x4   :  { %680 = vsyncadd [#allocation4], 4294967280 }
   0x5   :  { %14 = sfence }
   0x6   :  { %15 = vsyncpa [#allocation7], 0  ;;  %s16_s13 = sld [smem:[#allocation5]] }
   0xc   :  { %s17_s16 = scalar_lea.vmem %s778_s1, %s16_s13 }
   0xd   :  { %v32_v0 = vld [vmem:[%s17_s16] sm:$0x1] }
   0xe   :  { %33 = vst [vmem:[#allocation2] sm:$0x1] %v32_v0 }
   0xf   :  { %51 = vsyncadd [#allocation3], 16  ;;  %s598_s17 = sld [smem:[#allocation5 + $0x1]] }
  0x15   :  { %s53_s0 = scalar_lea.vmem %s778_s1, %s598_s17 }
  0x16   :  { %v70_v1 = vld [vmem:[%s53_s0] sm:$0x1] }
  0x17   :  { %71 = vst [vmem:[#allocation2 + $0x1] sm:$0x1] %v70_v1 }
  0x18   :  { %89 = vsyncadd [#allocation3 + $0x1], 16  ;;  %s599_s20 = sld [smem:[#allocation5 + $0x2]] }
  0x1e   :  { %s91_s23 = scalar_lea.vmem %s778_s1, %s599_s20 }
  0x1f   :  { %v108_v2 = vld [vmem:[%s91_s23] sm:$0x1] }
  0x20   :  { %109 = vst [vmem:[#allocation2 + $0x2] sm:$0x1] %v108_v2 }
  0x21   :  { %127 = vsyncadd [#allocation3 + $0x2], 16  ;;  %s600_s24 = sld [smem:[#allocation5 + $0x3]] }
  0x27   :  { %s129_s27 = scalar_lea.vmem %s778_s1, %s600_s24 }
  0x28   :  { %v146_v3 = vld [vmem:[%s129_s27] sm:$0x1] }
  0x29   :  { %147 = vst [vmem:[#allocation2 + $0x3] sm:$0x1] %v146_v3 }
  0x2a   :  { %165 = vsyncadd [#allocation3 + $0x3], 16  ;;  %s601_s28 = sld [smem:[#allocation5 + $0x4]] }
  0x30   :  { %s167_s3 = scalar_lea.vmem %s778_s1, %s601_s28 }
  0x31   :  { %v184_v4 = vld [vmem:[%s167_s3] sm:$0x1] }
  0x32   :  { %185 = vst [vmem:[#allocation2 + $0x4] sm:$0x1] %v184_v4 }
  0x33   :  { %203 = vsyncadd [#allocation3 + $0x4], 16  ;;  %s602_s4 = sld [smem:[#allocation5 + $0x5]] }
  0x39   :  { %s205_s7 = scalar_lea.vmem %s778_s1, %s602_s4 }
  0x3a   :  { %v222_v5 = vld [vmem:[%s205_s7] sm:$0x1] }
  0x3b   :  { %223 = vst [vmem:[#allocation2 + $0x5] sm:$0x1] %v222_v5 }
  0x3c   :  { %241 = vsyncadd [#allocation3 + $0x5], 16  ;;  %s603_s8 = sld [smem:[#allocation5 + $0x6]] }
  0x42   :  { %s243_s11 = scalar_lea.vmem %s778_s1, %s603_s8 }
  0x43   :  { %v260_v6 = vld [vmem:[%s243_s11] sm:$0x1] }
  0x44   :  { %261 = vst [vmem:[#allocation2 + $0x6] sm:$0x1] %v260_v6 }
  0x45   :  { %279 = vsyncadd [#allocation3 + $0x6], 16  ;;  %s604_s12 = sld [smem:[#allocation5 + $0x7]] }
  0x4b   :  { %s281_s15 = scalar_lea.vmem %s778_s1, %s604_s12 }
  0x4c   :  { %v298_v7 = vld [vmem:[%s281_s15] sm:$0x1] }
  0x4d   :  { %299 = vst [vmem:[#allocation2 + $0x7] sm:$0x1] %v298_v7 }
  0x4e   :  { %317 = vsyncadd [#allocation3 + $0x7], 16  ;;  %s733_s16 = smov 0  }
  0x4f LB: > { %p324_p0 = scmp.lt.s32.totalorder %s687_s16, 0  ;;  %s325_s17 = ssub.s32 0, %s687_s16  ;;  %s687_s16 = sphi %s733_s16, %s323_s16  }
  0x50   : > { %s605_s18 = smin.u32 %s687_s16, %s325_s17 }
  0x51   : > { %s327_s19 = sand.u32 7, %s605_s18  }
  0x52   : > { %s328_s0 = ssub.s32 0, %s327_s19 }
  0x53   : > { %s781_s0 = smov (!%p324_p0, %s328_s0), %s327_s19 }
  0x54   : > { %p607_p1 = scmp.lt.s32.totalorder %s781_s0, 0  ;;  %s334_s20 = sadd.s32 8, %s781_s0 }
  0x56   : > { %s783_s20 = smov (!%p607_p1, %s334_s20), %s781_s0 }
  0x57   : > { %s336_s21 = scalar_lea.sflag [#allocation3], %s783_s20 }
  0x58   : > { %681 = dma.done.wait %s336_s21, 16 }
  0x59   : > { %682 = vsyncadd %s336_s21, 4294967280  ;;  %s340_s22 = sadd.s32 8, %s687_s16 }
  0x5a   : > { %p608_p2 = scmp.ge.s32.totalorder %s340_s22, 32 }
  0x5b   : > { %s345_s23 = sld [smem:[#allocation5 + %s340_s22]] (!%p608_p2)  ;;  %p346_p3 = scmp.lt.s32.totalorder (!%p608_p2), %s340_s22, 0 }
  0x5c   : > { %344 = sbr.rel (%p608_p2) target bundleno = 103 (0x67), region = 252  ;;  %s347_s24 = ssub.s32 (!%p608_p2), 0, %s340_s22 }
  0x5d   : > { %s609_s25 = smin.u32 (!%p608_p2), %s347_s24, %s340_s22  ;;  %s554_s4 = scalar_lea.vmem (!%p608_p2), [#allocation2], %s687_s16 }
  0x5e   : > { %s349_s26 = sand.u32 (!%p608_p2), 7, %s609_s25  }
  0x5f   : > { %s350_s27 = ssub.s32 (!%p608_p2), 0, %s349_s26 }
  0x61   : > { %s785_s27 = smov (!%p346_p3, %s350_s27), %s349_s26  ;;  %s358_s30 = scalar_lea.vmem %s778_s1, %s345_s23 }
  0x62   : > { %p611_p4 = scmp.lt.s32.totalorder %s785_s27, 0  ;;  %s356_s3 = sadd.s32 8, %s785_s27  ;;  %v375_v8 = vld [vmem:[%s358_s30] sm:$0x1] }
  0x63   : > { %612 = vst [vmem:[%s554_s4 + $0x8] sm:$0x1] %v375_v8 }
  0x64   : > { %s787_s3 = smov (!%p611_p4, %s356_s3), %s785_s27 }
  0x65   : > { %s360_s5 = scalar_lea.sflag [#allocation3], %s787_s3 }
  0x66   : > { %394 = vsyncadd %s360_s5, 16 }
  0x67 PF: > { %s323_s16 = sadd.s32 1, %s687_s16  }
  0x68   : > { %p320_p5 = scmp.ge.s32.totalorder %s323_s16, 32  }
  0x69   :  { %vm403_vm0 = vcmask (%p320_p5), 523264   ;;  %s690_s1 = smov (%p320_p5), [#allocation6]   ;;  %s480_s9 = sshll.u32 (%p320_p5), %s779_s2, 4  ;;  %s481_s9 = int_to_ptr.hbm [resolvable:$true] %s480_s9 }
  0x6a   :  { %322 = sbr.rel (!%p320_p5) target bundleno = 79 (0x4f), region = 370  ;;  %v749_v9 = vld [vmem:[#allocation2 + $0x10] sm:$0xff] (%p320_p5)  ;;  %v751_v10 = vld [vmem:[#allocation2] sm:$0xff] (%p320_p5)  ;;  %v757_v13 = vld [vmem:[#allocation2 + $0x18] sm:$0xff] (%p320_p5)  ;;  %s478_s6 = sshll.u32 (%p320_p5), %s690_s1, 4  ;;  %s479_s6 = int_to_ptr.vmem [resolvable:$true] %s478_s6 }
  0x6b   :  { %v401_v11 = vmul.f32 (%p320_p5), %v749_v9, %v749_v9  ;;  %v399_v12 = vmul.f32 (%p320_p5), %v751_v10, %v751_v10  ;;  %v759_v14 = vld [vmem:[#allocation2 + $0x8] sm:$0xff] (%p320_p5)  ;;  %v402_v17 = vmul.f32 (%p320_p5), %v757_v13, %v757_v13 }
  0x6c   :  { %v400_v18 = vmul.f32 (%p320_p5), %v759_v14, %v759_v14 }
  0x6d   :  { %v410_v15 = vsel (%p320_p5), %vm403_vm0, %v401_v11, 0.0  ;;  %v404_v16 = vsel (%p320_p5), %vm403_vm0, %v399_v12, 0.0  ;;  %v413_v19 = vsel (%p320_p5), %vm403_vm0, %v402_v17, 0.0 }
  0x6e   :  { %411 = vadd.xlane.f32.xlu1 (%p320_p5), %v410_v15  ;;  %405 = vadd.xlane.f32.xlu0 (%p320_p5), %v404_v16  ;;  %v407_v20 = vsel (%p320_p5), %vm403_vm0, %v400_v18, 0.0 }
  0x76   :  { %414 = vadd.xlane.f32.xlu1 %v413_v19  ;;  %408 = vadd.xlane.f32.xlu0 %v407_v20 }
  0xe1   :  { %v412_v21 = vpop.xlane.xlu1 %411  ;;  %v406_v22 = vpop.xlane.xlu0 %405 }
  0xe2   :  { %v418_v23 = vadd.f32 1e-14, %v412_v21  ;;  %v416_v24 = vadd.f32 1e-14, %v406_v22 }
  0xe4   :  { %631 = vrsqrt.f32 %v418_v23  ;;  %vm426_vm3 = vweird.f32 %v416_v24  ;;  %vm446_vm6 = vweird.f32 %v418_v23 }
  0xe5   :  { %633 = vrsqrt.f32 %v416_v24 }
  0xe9   :  { %v415_v25 = vpop.xlane.xlu1 %414  ;;  %v409_v26 = vpop.xlane.xlu0 %408 }
  0xea   :  { %v632_v27 = vpop.eup %631  ;;  %v419_v28 = vadd.f32 1e-14, %v415_v25  ;;  %v417_v29 = vadd.f32 1e-14, %v409_v26 }
  0xeb   :  { %v634_v30 = vpop.eup %633  ;;  %v441_v31 = vmul.f32 %v632_v27, %v418_v23  ;;  %vm447_vm2 = vweird.f32 %v632_v27 }
  0xec   :  { %v421_v32 = vmul.f32 %v634_v30, %v416_v24  ;;  %635 = vrsqrt.f32 %v419_v28  ;;  %vm427_vm1 = vweird.f32 %v634_v30  ;;  %vm448_vm8 = vmor %vm446_vm6, %vm447_vm2  ;;  %vm456_vm9 = vweird.f32 %v419_v28 }
  0xed   :  { %v442_v33 = vmul.f32 %v632_v27, %v441_v31  ;;  %637 = vrsqrt.f32 %v417_v29  ;;  %vm428_vm4 = vmor %vm426_vm3, %vm427_vm1  ;;  %vm436_vm11 = vweird.f32 %v417_v29 }
  0xee   :  { %v422_v34 = vmul.f32 %v634_v30, %v421_v32 }
  0xef   :  { %v443_v35 = vmul.f32 0.5, %v442_v33 }
  0xf0   :  { %v423_v36 = vmul.f32 0.5, %v422_v34 }
  0xf1   :  { %v444_v41 = vsub.f32 1.5, %v443_v35 }
  0xf2   :  { %v636_v37 = vpop.eup %635  ;;  %v424_v38 = vsub.f32 1.5, %v423_v36 }
  0xf3   :  { %v638_v39 = vpop.eup %637  ;;  %v451_v40 = vmul.f32 %v636_v37, %v419_v28  ;;  %v445_v47 = vmul.f32 %v632_v27, %v444_v41  ;;  %vm457_vm5 = vweird.f32 %v636_v37 }
  0xf4   :  { %v431_v42 = vmul.f32 %v638_v39, %v417_v29  ;;  %v425_v44 = vmul.f32 %v634_v30, %v424_v38  ;;  %vm437_vm7 = vweird.f32 %v638_v39  ;;  %vm458_vm10 = vmor %vm456_vm9, %vm457_vm5 }
  0xf5   :  { %v452_v43 = vmul.f32 %v636_v37, %v451_v40  ;;  %v449_v53 = vsel %vm448_vm8, %v632_v27, %v445_v47  ;;  %vm438_vm12 = vmor %vm436_vm11, %vm437_vm7 }
  0xf6   :  { %v432_v45 = vmul.f32 %v638_v39, %v431_v42  ;;  %v429_v50 = vsel %vm428_vm4, %v634_v30, %v425_v44  ;;  %v462_v58 = vmin.f32 %v449_v53, 1.0 }
  0xf7   :  { %v453_v46 = vmul.f32 0.5, %v452_v43  ;;  %v460_v55 = vmin.f32 %v429_v50, 1.0 }
  0xf8   :  { %v433_v48 = vmul.f32 0.5, %v432_v45  ;;  %v466_v63 = vmul.f32 %v462_v58, %v749_v9 }
  0xf9   :  { %v454_v49 = vsub.f32 1.5, %v453_v46  ;;  %v464_v62 = vmul.f32 %v460_v55, %v751_v10 }
  0xfa   :  { %v434_v51 = vsub.f32 1.5, %v433_v48 }
  0xfb   :  { %v455_v52 = vmul.f32 %v636_v37, %v454_v49 }
  0xfc   :  { %v435_v54 = vmul.f32 %v638_v39, %v434_v51 }
  0xfd   :  { %v459_v56 = vsel %vm458_vm10, %v636_v37, %v455_v52 }
  0xfe   :  { %v439_v57 = vsel %vm438_vm12, %v638_v39, %v435_v54  ;;  %v463_v60 = vmin.f32 %v459_v56, 1.0 }
  0xff   :  { %v461_v59 = vmin.f32 %v439_v57, 1.0 }
 0x100   :  { %v467_v1 = vmul.f32 %v463_v60, %v757_v13 }
 0x101   :  { %v465_v61 = vmul.f32 %v461_v59, %v759_v14 }
 0x103   :  { %v468_v0 = vadd.f32 %v465_v61, %v464_v62 }
 0x105   :  { %v469_v2 = vadd.f32 %v468_v0, %v466_v63 }
 0x107   :  { %v470_v3 = vadd.f32 %v469_v2, %v467_v1 }
 0x109   :  { %v471_v4 = vmul.f32 0.25, %v470_v3 }
 0x10b   :  { %472 = vst.msk [vmem:[#allocation6] sm:$0xff] %vm403_vm0, %v471_v4 }
 0x10c   :  { %483 = dma.vmem_to_hbm [thread:$0]  %s479_s6, 128, %s481_s9, [#allocation7]  }
 0x10d   :  { %683 = dma.done.wait [#allocation7], 128  }
 0x10e   :  { %684 = vsyncadd [#allocation7], 4294967168 }
 0x10f   :  { %488 = vsyncpa [#allocation7], 1 }
 0x110   :  { %489 = vsyncmov [#allocation3] }
 0x113   :  { %s490_s10 = vpop.sfrf %489 }
 0x114   :  { %p613_p6 = scmp.ne.s32.totalorder %s490_s10, 0 }
 0x116   :  { %494 = shalt.err (%p613_p6)  }
 0x117   :  { %496 = vsyncmov [#allocation3 + $0x1] }
 0x11a   :  { %s497_s11 = vpop.sfrf %496 }
 0x11b   :  { %p614_p7 = scmp.ne.s32.totalorder %s497_s11, 0 }
 0x11d   :  { %501 = shalt.err (%p614_p7)  }
 0x11e   :  { %503 = vsyncmov [#allocation3 + $0x2] }
 0x121   :  { %s504_s2 = vpop.sfrf %503 }
 0x122   :  { %p615_p8 = scmp.ne.s32.totalorder %s504_s2, 0 }
 0x124   :  { %508 = shalt.err (%p615_p8)  }
 0x125   :  { %510 = vsyncmov [#allocation3 + $0x3] }
 0x128   :  { %s511_s12 = vpop.sfrf %510 }
 0x129   :  { %p616_p9 = scmp.ne.s32.totalorder %s511_s12, 0 }
 0x12b   :  { %515 = shalt.err (%p616_p9)  }
 0x12c   :  { %517 = vsyncmov [#allocation3 + $0x4] }
 0x12f   :  { %s518_s13 = vpop.sfrf %517 }
 0x130   :  { %p617_p10 = scmp.ne.s32.totalorder %s518_s13, 0 }
 0x132   :  { %522 = shalt.err (%p617_p10)  }
 0x133   :  { %524 = vsyncmov [#allocation3 + $0x5] }
 0x136   :  { %s525_s14 = vpop.sfrf %524 }
 0x137   :  { %p618_p11 = scmp.ne.s32.totalorder %s525_s14, 0 }
 0x139   :  { %529 = shalt.err (%p618_p11)  }
 0x13a   :  { %531 = vsyncmov [#allocation3 + $0x6] }
 0x13d   :  { %s532_s15 = vpop.sfrf %531 }
 0x13e   :  { %p619_p12 = scmp.ne.s32.totalorder %s532_s15, 0 }
 0x140   :  { %536 = shalt.err (%p619_p12)  }
 0x141   :  { %538 = vsyncmov [#allocation3 + $0x7] }
 0x144   :  { %s539_s16 = vpop.sfrf %538 }
 0x145   :  { %p620_p13 = scmp.ne.s32.totalorder %s539_s16, 0 }
 0x147   :  { %543 = shalt.err (%p620_p13)  }

</bundles_post_ra>
